<compile_context>
chip_gen: v7x
topology: tpu7x:2x2x1
jax: 0.10.0
libtpu: 0.0.40
codegen_flags: <defaults>
</compile_context>

<pallas_src>
import jax
import jax.numpy as jnp
from jax.experimental import pallas as pl
from jax.experimental.pallas import tpu as pltpu


# ----------------------------------------------------------------------------
# Pallas kernel: one grid step processes a group of BPG graphs.
#   a_ref : (BPG, N, N)      f32   normalized adjacencies of the group
#   x_ref : (BPG*N, F_pad)   f32   node features, batch folded into rows (M)
#   w1/w2 : (F_pad/H_pad, H_pad) f32 shared weights, b1/b2: (1, H_pad) f32
#   o_ref : (BPG, N, H_pad)  f32
# MXU matmuls take bf16 operands (cast in-kernel) with f32 accumulation.
# ----------------------------------------------------------------------------
def tsp_gnn_kernel(a_ref, x_ref, w1_ref, b1_ref, w2_ref, b2_ref, o_ref):
    bpg, n, _ = a_ref.shape
    h_pad = w1_ref.shape[-1]

    a = a_ref[...].astype(jnp.bfloat16)            # (BPG, N, N)
    x = x_ref[...].astype(jnp.bfloat16)            # (BPG*N, F_pad)
    w1 = w1_ref[...].astype(jnp.bfloat16)
    w2 = w2_ref[...].astype(jnp.bfloat16)

    # ----- Layer 1: relu(A @ (X @ W1) + b1) -----
    xw1 = jnp.dot(x, w1, preferred_element_type=jnp.float32)      # (BPG*N, H)
    xw1 = xw1.astype(jnp.bfloat16).reshape(bpg, n, h_pad)
    h1 = jnp.einsum('bij,bjh->bih', a, xw1,
                    preferred_element_type=jnp.float32)            # (BPG, N, H)
    h1 = h1.reshape(bpg * n, h_pad)
    h1 = jnp.maximum(h1 + b1_ref[...], 0.0)                        # f32 epilogue

    # ----- Layer 2: relu(A @ (H1 @ W2) + b2) -----
    hw2 = jnp.dot(h1.astype(jnp.bfloat16), w2,
                  preferred_element_type=jnp.float32)              # (BPG*N, H)
    hw2 = hw2.astype(jnp.bfloat16).reshape(bpg, n, h_pad)
    h2 = jnp.einsum('bij,bjh->bih', a, hw2,
                    preferred_element_type=jnp.float32)            # (BPG, N, H)
    h2 = h2.reshape(bpg * n, h_pad)
    h2 = jnp.maximum(h2 + b2_ref[...], 0.0)

    o_ref[...] = h2.reshape(bpg, n, h_pad)


def tsp_gnn_forward(a_norm, x, w1, b1, w2, b2, *, num_steps=None):
    """a_norm: (B,N,N) f32, x: (B,N,F_pad) f32, w1: (F_pad,H_pad),
    w2: (H_pad,H_pad), b1/b2: (1,H_pad). Returns (B, N, H_pad) f32."""
    B, N, _ = a_norm.shape
    f_pad = x.shape[-1]
    h_pad = w1.shape[-1]

    if num_steps is None:
        # 2 parallel steps keep both v7x TensorCores busy; on v5e/v6e the
        # difference vs a single fused step is one ~0.35 us step boundary.
        num_steps = 2 if (B % 2 == 0 and B >= 2) else 1
    bpg = B // num_steps
    assert bpg * num_steps == B

    # Fold the batch into the matmul M dimension for the weight matmuls.
    x_flat = x.reshape(B * N, f_pad)

    out = pl.pallas_call(
        tsp_gnn_kernel,
        out_shape=jax.ShapeDtypeStruct((B, N, h_pad), jnp.float32),
        grid=(num_steps,),
        in_specs=[
            pl.BlockSpec((bpg, N, N), lambda g: (g, 0, 0)),       # A_norm group
            pl.BlockSpec((bpg * N, f_pad), lambda g: (g, 0)),     # X group (flat)
            pl.BlockSpec((f_pad, h_pad), lambda g: (0, 0)),       # W1 (shared)
            pl.BlockSpec((1, h_pad), lambda g: (0, 0)),           # b1
            pl.BlockSpec((h_pad, h_pad), lambda g: (0, 0)),       # W2
            pl.BlockSpec((1, h_pad), lambda g: (0, 0)),           # b2
        ],
        out_specs=pl.BlockSpec((bpg, N, h_pad), lambda g: (g, 0, 0)),
        compiler_params=pltpu.CompilerParams(
            dimension_semantics=("parallel",)),   # graph groups are independent
    )(a_norm, x_flat, w1, b1, w2, b2)
    return out


# ----------------------------------------------------------------------------
# Glue: GCN-normalized dense adjacency from edge_index (plain JAX).
# Matches PyG GCNConv defaults: add_remaining_self_loops + symmetric norm.
# ----------------------------------------------------------------------------
def gcn_normalized_adjacency(edge_index, num_nodes):
    src = edge_index[0]
    dst = edge_index[1]
    a = jnp.zeros((num_nodes, num_nodes), dtype=jnp.float32)
    a = a.at[dst, src].add(1.0)                      # message src -> dst
    # add_remaining_self_loops: only nodes lacking a self-loop get one.
    has_self = jnp.diag(a) > 0
    a = a + jnp.diag(jnp.where(has_self, 0.0, 1.0))
    deg = jnp.sum(a, axis=1)
    d_inv_sqrt = jnp.where(deg > 0, jax.lax.rsqrt(deg), 0.0)
    return d_inv_sqrt[:, None] * a * d_inv_sqrt[None, :]


def glorot(key, shape):
    fan_in, fan_out = shape
    limit = jnp.sqrt(6.0 / (fan_in + fan_out))
    return jax.random.uniform(key, shape, jnp.float32, -limit, limit)


# Pure-f32 reference — semantic ground truth (matches PyTorch forward).
def reference_forward_f32(a_norm, x, w1, b1, w2, b2):
    h = jnp.maximum(jnp.einsum('bij,bjh->bih', a_norm, x @ w1) + b1, 0.0)
    h = jnp.maximum(jnp.einsum('bij,bjh->bih', a_norm, h @ w2) + b2, 0.0)
    return h


# bf16-emulated reference mirroring the kernel's exact cast/association pattern.
def reference_forward_bf16(a_norm, x, w1, b1, w2, b2):
    bf = lambda v: v.astype(jnp.bfloat16).astype(jnp.float32)
    a, xx, w1f, w2f = bf(a_norm), bf(x), bf(w1), bf(w2)
    xw1 = bf(xx @ w1f)
    h1 = jnp.maximum(jnp.einsum('bij,bjh->bih', a, xw1) + b1, 0.0)
    hw2 = bf(bf(h1) @ w2f)
    h2 = jnp.einsum('bij,bjh->bih', a, hw2)
    return jnp.maximum(h2 + b2, 0.0)


if __name__ == "__main__":
    key = jax.random.PRNGKey(0)
    k_w1, k_w2, k_graphs = jax.random.split(key, 3)

    B = 4           # batch of TSP instances (fused into matmul M / 2 grid steps)
    N = 16          # nodes (cities) per instance
    IN_DIM = 2      # (x, y) coordinates
    HIDDEN = 64     # module default hidden_dim
    F_PAD = 8       # pad tiny feature dim (2 -> 8); exact zero-pad, no-op
    H_PAD = 128     # pad hidden dim to a full lane width (lane-dense stores)

    # Per-graph node features + edge lists (ring tour + random non-self chords).
    xs, adjs = [], []
    gkeys = jax.random.split(k_graphs, B)
    ring_src = jnp.arange(N, dtype=jnp.int32)
    ring_dst = (ring_src + 1) % N
    for b in range(B):
        kx, ks, ko = jax.random.split(gkeys[b], 3)
        xs.append(jax.random.uniform(kx, (N, IN_DIM), jnp.float32))
        chord_src = jax.random.randint(ks, (8,), 0, N, dtype=jnp.int32)
        chord_off = jax.random.randint(ko, (8,), 1, N, dtype=jnp.int32)
        chord_dst = (chord_src + chord_off) % N          # never a self-loop
        src = jnp.concatenate([ring_src, ring_dst, chord_src, chord_dst])
        dst = jnp.concatenate([ring_dst, ring_src, chord_dst, chord_src])
        adjs.append(gcn_normalized_adjacency(jnp.stack([src, dst]), N))
    x = jnp.stack(xs)            # (B, N, 2)
    a_norm = jnp.stack(adjs)     # (B, N, N)

    # Parameters (GCNConv: glorot weight, zero bias).
    w1 = glorot(k_w1, (IN_DIM, HIDDEN))
    b1 = jnp.zeros((1, HIDDEN), jnp.float32)
    w2 = glorot(k_w2, (HIDDEN, HIDDEN))
    b2 = jnp.zeros((1, HIDDEN), jnp.float32)
    # TODO(synk): self.out = Linear(hidden_dim, 1) is unused in forward(); not applied.

    # Zero-pad feature dim (2 -> 8) and hidden dim (64 -> 128) for TPU layout.
    x_pad = jnp.zeros((B, N, F_PAD), jnp.float32).at[:, :, :IN_DIM].set(x)
    w1_pad = jnp.zeros((F_PAD, H_PAD), jnp.float32).at[:IN_DIM, :HIDDEN].set(w1)
    b1_pad = jnp.zeros((1, H_PAD), jnp.float32).at[:, :HIDDEN].set(b1)
    w2_pad = jnp.zeros((H_PAD, H_PAD), jnp.float32).at[:HIDDEN, :HIDDEN].set(w2)
    b2_pad = jnp.zeros((1, H_PAD), jnp.float32).at[:, :HIDDEN].set(b2)

    out_full = tsp_gnn_forward(a_norm, x_pad, w1_pad, b1_pad, w2_pad, b2_pad)
    out_full = jax.block_until_ready(out_full)
    assert out_full.shape == (B, N, H_PAD)

    out = out_full[:, :, :HIDDEN]                     # real hidden features
    assert jnp.all(out_full[:, :, HIDDEN:] == 0.0)    # pad columns stay zero

    ref_bf16 = reference_forward_bf16(a_norm, x, w1, b1, w2, b2)
    assert jnp.allclose(out, ref_bf16, atol=5e-3, rtol=5e-3), \
        "mismatch vs bf16-emulated reference"

    ref_f32 = reference_forward_f32(a_norm, x, w1, b1, w2, b2)
    assert jnp.allclose(out, ref_f32, atol=5e-2, rtol=5e-2), \
        "mismatch vs f32 reference"

    print("KERNEL_OK")
</pallas_src>

<mosaic_0001>
module attributes {stable_mosaic.version = 11 : i64} {
  func.func @tsp_gnn_kernel(%arg0: i32, %arg1: memref<2x16x16xf32, #tpu.memory_space<vmem>>, %arg2: memref<32x8xf32, #tpu.memory_space<vmem>>, %arg3: memref<8x128xf32, #tpu.memory_space<vmem>>, %arg4: memref<1x128xf32, #tpu.memory_space<vmem>>, %arg5: memref<128x128xf32, #tpu.memory_space<vmem>>, %arg6: memref<1x128xf32, #tpu.memory_space<vmem>>, %arg7: memref<2x16x128xf32, #tpu.memory_space<vmem>>) attributes {dimension_semantics = [#tpu.dimension_semantics<parallel>], iteration_bounds = array<i64: 2>, scalar_prefetch = 0 : i64, scratch_operands = 0 : i64, tpu.core_type = #tpu.core_type<tc>, window_params = [{transform_indices = @transform_0, window_bounds = array<i64: 2, 16, 16>}, {transform_indices = @transform_1, window_bounds = array<i64: 32, 8>}, {pipeline_mode = #tpu.pipeline_mode<synchronous>, transform_indices = @transform_2, window_bounds = array<i64: 8, 128>}, {pipeline_mode = #tpu.pipeline_mode<synchronous>, transform_indices = @transform_3, window_bounds = array<i64: 1, 128>}, {pipeline_mode = #tpu.pipeline_mode<synchronous>, transform_indices = @transform_4, window_bounds = array<i64: 128, 128>}, {pipeline_mode = #tpu.pipeline_mode<synchronous>, transform_indices = @transform_5, window_bounds = array<i64: 1, 128>}, {transform_indices = @transform_6, window_bounds = array<i64: 2, 16, 128>}]} {
    %c0 = arith.constant 0 : index
    %c0_0 = arith.constant 0 : index
    %c0_1 = arith.constant 0 : index
    %0 = vector.load %arg1[%c0, %c0_0, %c0_1] : memref<2x16x16xf32, #tpu.memory_space<vmem>>, vector<2x16x16xf32>
    %1 = arith.truncf %0 : vector<2x16x16xf32> to vector<2x16x16xbf16>
    %c0_2 = arith.constant 0 : index
    %c0_3 = arith.constant 0 : index
    %2 = vector.load %arg2[%c0_2, %c0_3] : memref<32x8xf32, #tpu.memory_space<vmem>>, vector<32x8xf32>
    %3 = arith.truncf %2 : vector<32x8xf32> to vector<32x8xbf16>
    %c0_4 = arith.constant 0 : index
    %c0_5 = arith.constant 0 : index
    %4 = vector.load %arg3[%c0_4, %c0_5] : memref<8x128xf32, #tpu.memory_space<vmem>>, vector<8x128xf32>
    %5 = arith.truncf %4 : vector<8x128xf32> to vector<8x128xbf16>
    %c0_6 = arith.constant 0 : index
    %c0_7 = arith.constant 0 : index
    %6 = vector.load %arg5[%c0_6, %c0_7] : memref<128x128xf32, #tpu.memory_space<vmem>>, vector<128x128xf32>
    %7 = arith.truncf %6 : vector<128x128xf32> to vector<128x128xbf16>
    %cst = arith.constant dense<0.000000e+00> : vector<32x128xf32>
    %8 = tpu.matmul %3, %5, %cst {dimension_numbers = #tpu.dot_dimension_numbers<[1], [0], [0], [1], [0, 0, 1, 1], [], []>} : vector<32x8xbf16>, vector<8x128xbf16>, vector<32x128xf32> -> vector<32x128xf32>
    %9 = arith.truncf %8 : vector<32x128xf32> to vector<32x128xbf16>
    %10 = vector.shape_cast %9 : vector<32x128xbf16> to vector<2x16x128xbf16>
    "tpu.trace_start"() <{level = 10 : i32, message = "bij,bjh->bih"}> : () -> ()
    %cst_8 = arith.constant dense<0.000000e+00> : vector<2x16x128xf32>
    %11 = tpu.matmul %1, %10, %cst_8 {dimension_numbers = #tpu.dot_dimension_numbers<[2], [1], [1], [2], [0, 0, 0, 1, 1, 2], [0], [0]>} : vector<2x16x16xbf16>, vector<2x16x128xbf16>, vector<2x16x128xf32> -> vector<2x16x128xf32>
    "tpu.trace_stop"() : () -> ()
    %12 = vector.shape_cast %11 : vector<2x16x128xf32> to vector<32x128xf32>
    %c0_9 = arith.constant 0 : index
    %c0_10 = arith.constant 0 : index
    %13 = vector.load %arg4[%c0_9, %c0_10] : memref<1x128xf32, #tpu.memory_space<vmem>>, vector<1x128xf32>
    %14 = vector.broadcast %13 : vector<1x128xf32> to vector<32x128xf32>
    %15 = arith.addf %12, %14 : vector<32x128xf32>
    %cst_11 = arith.constant 0.000000e+00 : f32
    %16 = vector.broadcast %cst_11 : f32 to vector<32x128xf32>
    %17 = arith.maximumf %15, %16 : vector<32x128xf32>
    %18 = arith.truncf %17 : vector<32x128xf32> to vector<32x128xbf16>
    %cst_12 = arith.constant dense<0.000000e+00> : vector<32x128xf32>
    %19 = tpu.matmul %18, %7, %cst_12 {dimension_numbers = #tpu.dot_dimension_numbers<[1], [0], [0], [1], [0, 0, 1, 1], [], []>} : vector<32x128xbf16>, vector<128x128xbf16>, vector<32x128xf32> -> vector<32x128xf32>
    %20 = arith.truncf %19 : vector<32x128xf32> to vector<32x128xbf16>
    %21 = vector.shape_cast %20 : vector<32x128xbf16> to vector<2x16x128xbf16>
    "tpu.trace_start"() <{level = 10 : i32, message = "bij,bjh->bih"}> : () -> ()
    %cst_13 = arith.constant dense<0.000000e+00> : vector<2x16x128xf32>
    %22 = tpu.matmul %1, %21, %cst_13 {dimension_numbers = #tpu.dot_dimension_numbers<[2], [1], [1], [2], [0, 0, 0, 1, 1, 2], [0], [0]>} : vector<2x16x16xbf16>, vector<2x16x128xbf16>, vector<2x16x128xf32> -> vector<2x16x128xf32>
    "tpu.trace_stop"() : () -> ()
    %23 = vector.shape_cast %22 : vector<2x16x128xf32> to vector<32x128xf32>
    %c0_14 = arith.constant 0 : index
    %c0_15 = arith.constant 0 : index
    %24 = vector.load %arg6[%c0_14, %c0_15] : memref<1x128xf32, #tpu.memory_space<vmem>>, vector<1x128xf32>
    %25 = vector.broadcast %24 : vector<1x128xf32> to vector<32x128xf32>
    %26 = arith.addf %23, %25 : vector<32x128xf32>
    %cst_16 = arith.constant 0.000000e+00 : f32
    %27 = vector.broadcast %cst_16 : f32 to vector<32x128xf32>
    %28 = arith.maximumf %26, %27 : vector<32x128xf32>
    %29 = vector.shape_cast %28 : vector<32x128xf32> to vector<2x16x128xf32>
    %c0_17 = arith.constant 0 : index
    %c0_18 = arith.constant 0 : index
    %c0_19 = arith.constant 0 : index
    %30 = vector.load %arg7[%c0_17, %c0_18, %c0_19] : memref<2x16x128xf32, #tpu.memory_space<vmem>>, vector<2x16x128xf32>
    tpu.vector_store %arg7[%c0_17, %c0_18, %c0_19], %29 {strides = array<i32>} : memref<2x16x128xf32, #tpu.memory_space<vmem>>, vector<2x16x128xf32>,
    return
  }
  func.func @transform_0(%arg0: i32) -> (i32, i32, i32) {
    %c0_i32 = arith.constant 0 : i32
    %c0_i32_0 = arith.constant 0 : i32
    %c0_i32_1 = arith.constant 0 : i32
    return %arg0, %c0_i32, %c0_i32_0 : i32, i32, i32
  }
  func.func @transform_1(%arg0: i32) -> (i32, i32) {
    %c0_i32 = arith.constant 0 : i32
    %c0_i32_0 = arith.constant 0 : i32
    return %arg0, %c0_i32 : i32, i32
  }
  func.func @transform_2(%arg0: i32) -> (i32, i32) {
    %c0_i32 = arith.constant 0 : i32
    %c0_i32_0 = arith.constant 0 : i32
    %c0_i32_1 = arith.constant 0 : i32
    return %c0_i32, %c0_i32_0 : i32, i32
  }
  func.func @transform_3(%arg0: i32) -> (i32, i32) {
    %c0_i32 = arith.constant 0 : i32
    %c0_i32_0 = arith.constant 0 : i32
    %c0_i32_1 = arith.constant 0 : i32
    return %c0_i32, %c0_i32_0 : i32, i32
  }
  func.func @transform_4(%arg0: i32) -> (i32, i32) {
    %c0_i32 = arith.constant 0 : i32
    %c0_i32_0 = arith.constant 0 : i32
    %c0_i32_1 = arith.constant 0 : i32
    return %c0_i32, %c0_i32_0 : i32, i32
  }
  func.func @transform_5(%arg0: i32) -> (i32, i32) {
    %c0_i32 = arith.constant 0 : i32
    %c0_i32_0 = arith.constant 0 : i32
    %c0_i32_1 = arith.constant 0 : i32
    return %c0_i32, %c0_i32_0 : i32, i32
  }
  func.func @transform_6(%arg0: i32) -> (i32, i32, i32) {
    %c0_i32 = arith.constant 0 : i32
    %c0_i32_0 = arith.constant 0 : i32
    %c0_i32_1 = arith.constant 0 : i32
    return %arg0, %c0_i32, %c0_i32_0 : i32, i32, i32
  }
}

</mosaic_0001>

<bundles_post_ra>
// kernel: tpu_custom_call.1
= control target key start
LH: loop header
LB: loop body
LE: loop exit
PB: predicated region body
PF: predicated region fallthrough
CT: control target
= control target key end

     0   :  { %11 = vsyncpa [#allocation3], 0  ;;  %s1223_s0 = inlined_call_operand.vmem [shape: f32[4,16,16], index: 0, kind: input, shape index: {}]   ;;  %s1224_s1 = inlined_call_operand.vmem [shape: f32[64,8], index: 1, kind: input, shape index: {}]   ;;  %s1225_s2 = inlined_call_operand.vmem [shape: f32[8,128], index: 2, kind: input, shape index: {}]   ;;  %s1226_s3 = inlined_call_operand.vmem [shape: f32[1,128], index: 3, kind: input, shape index: {}]   ;;  %s1227_s4 = inlined_call_operand.hbm [shape: f32[128,128], index: 4, kind: input, shape index: {}]   ;;  %s1228_s5 = inlined_call_operand.vmem [shape: f32[1,128], index: 5, kind: input, shape index: {}]   ;;  %s1229_s6 = inlined_call_operand.hbm [shape: f32[4,16,128], index: 6, kind: output, shape index: {}]  }
   0x1   :  { %12 = vsyncpa [#allocation4], 0 }
   0x2   :  { %14 = vsyncpa [#allocation4 + $0x1], 0  ;;  %s1049_s21 = smov 0   ;;  %s1051_s22 = smov 0  }
   0x3   :  { %s1053_s23 = smov 0   ;;  %s1055_s24 = smov 0  }
   0x4 LB: > { %s1070_s25 = sadd.s32 4294967295, %s1004_s24   ;;  %s753_s26 = sadd.s32 4294967294, %s1004_s24   ;;  %s1004_s24 = sphi %s1055_s24, %s1245_s24   ;;  %s1000_s23 = sphi %s1053_s23, %s1244_s23   ;;  %s996_s22 = sphi %s1051_s22, %s1243_s22   ;;  %s992_s21 = sphi %s1049_s21, %s1242_s21  }
   0x5   : > { %s1074_s27 = sadd.s32 1, %s1004_s24   ;;  %s163_s28 = sadd.s32 1, %s1000_s23 }
   0x6   : > { %s160_s29 = ssub.s32 %s1004_s24, %s1074_s27  ;;  %p173_p0 = scmp.ne.s32.totalorder %s1000_s23, %s996_s22 }
   0x7   : > { %p161_p1 = scmp.eq.s32.totalorder %s160_s29, 0  ;;  %p174_p2 = scmp.eq.s32.totalorder %s1070_s25, 1 }
   0x8   : > { %p179_p3 = scmp.ne.s32.totalorder %s996_s22, %s992_s21  ;;  %p180_p4 = scmp.eq.s32.totalorder %s753_s26, 1 }
   0x9   : > { %s1085_s30 = scalar_select %p161_p1, %s1000_s23, %s163_s28  }
   0xa   : > { %p1087_p5 = por %p174_p2, %p173_p0  ;;  %p1091_p6 = por %p180_p4, %p179_p3 }
   0xb   : > { %p754_p7 = scmp.ge.s32.totalorder %s1004_s24, 1  ;;  %p187_p8 = scmp.lt.s32.totalorder %s1004_s24, 3 }
   0xc   : > { %s1233_s7 = scalar_select %p1087_p5, 1, 0 }
   0xd   : > { %s1234_s8 = scalar_select %p1091_p6, 1, 0 }
   0xe   : > { %p1230_p9 = scmp.eq.s32.totalorder %s1070_s25, 0  ;;  %p1098_p10 = pnand %p754_p7, %p187_p8 }
   0xf   : > { %s1006_s10 = smov [#allocation2]   ;;  %s910_s15 = scalar_lea.hbm %s1227_s4, 2048 }
  0x10   : > { %s1235_s9 = scalar_select %p1098_p10, 1, 0 }
  0x11   : > { %s205_s11 = sshll.u32 %s1006_s10, 4  ;;  %p860_p11 = pneg %p1098_p10  ;;  %s206_s11 = int_to_ptr.vmem [resolvable:$true] %s205_s11 }
  0x12   : > { %p911_p13 = scmp.ne.s32.totalorder %s1227_s4, %s910_s15  ;;  %p917_p3 = scmp.lt.u32.totalorder %s910_s15, %s1227_s4 }
  0x13   : > { %p1106_p12 = pnand %p1230_p9, %p860_p11 }
  0x15   : > { %p912_p0 = pneg %p1106_p12 }
  0x17   : > { %p913_p1 = pnand %p912_p0, %p911_p13 }
  0x19   : > { %p914_p2 = pneg %p913_p1 }
  0x1b   : > { %p919_p4 = pnand %p917_p3, %p914_p2 }
  0x1d   : > { %922 = shalt.err (!%p919_p4)
}
  0x1e   : > { %s923_s20 = scalar_lea.vmem %s206_s11, 2048  ;;  %p931_p9 = scmp.lt.s32.totalorder %s206_s11, %s206_s11 }
  0x1f   : > { %p924_p7 = scmp.ne.s32.totalorder %s206_s11, %s923_s20  ;;  %p932_p6 = scmp.lt.s32.totalorder %s923_s20, %s923_s20 }
  0x21   : > { %p926_p8 = pnand %p924_p7, %p912_p0  ;;  %p933_p5 = por %p932_p6, %p931_p9 }
  0x23   : > { %p927_p11 = pneg %p926_p8 }
  0x25   : > { %p934_p10 = pnand %p933_p5, %p927_p11 }
  0x27   : > { %937 = shalt.err (!%p934_p10)
}
  0x28   : > { %s1007_s26 = smov 128   ;;  %s1008_s28 = smov 8  }
  0x29   : > { %863 = dma.hbm_to_vmem [thread:$0]  (!%p1106_p12), %s1227_s4, 2048, %s206_s11, [#allocation3], %s1007_s26, %s1007_s26, %s1008_s28  }
  0x2a   : > { %p1237_p13 = scmp.ne.s32.totalorder %s1235_s9, 0 }
  0x2b   : > { %p1238_p1 = scmp.eq.s32.totalorder (!%p1237_p13), %s1070_s25, 0 }
  0x2c   : > { %243 = sbr.rel (%p1237_p13) target bundleno = 964 (0x3c4), region = 44 }
  0x33   : > { %983 = dma.done.wait (%p1238_p1), [#allocation3], 2048   ;;  %p1239_p0 = pmov %p1238_p1 }
  0x34   : > { %s763_s13 = sshll.u32 %s1070_s25, 2  ;;  %v306_v0 = vld [vmem:[%s1225_s2] sm:$0xff]  ;;  %vm339_vm0 = vcmask 1043456   ;;  %vm332_vm1 = vcmask 64512   ;;  %v1009_v9 = vmov 0.0   ;;  %vm1010_vm2 = vmmov 0  }
  0x35   : > { %985 = vsyncadd (%p1239_p0), [#allocation3], 4294965248  ;;  %p287_p5 = scmp.lt.s32.totalorder %s763_s13, 7  ;;  %v307_v3 = vpack.c.bf16 %v306_v0, %v306_v0  ;;  %809 = vmatprep.subr.bf16.mxu1 %v1009_v9  ;;  %811 = vmatprep.mubr.msk.bf16.mxu1 %vm1010_vm2, %v1009_v9  ;;  %s760_s9 = sshll.u32 %s1070_s25, 1  ;;  %v308_v11 = vld [vmem:[#allocation2] sm:$0xff]  ;;  %v309_v12 = vld [vmem:[#allocation2 + $0x8] sm:$0xff] }
  0x36   : > { %p280_p6 = scmp.lt.s32.totalorder %s760_s9, 3  ;;  %v324_v21 = vpack.c.bf16 %v309_v12, %v308_v11  ;;  %v310_v24 = vld [vmem:[#allocation2 + $0x10] sm:$0xff]  ;;  %v311_v25 = vld [vmem:[#allocation2 + $0x18] sm:$0xff]  ;;  %vm394_vm3 = vcmask 130048   ;;  %v312_v28 = vld [vmem:[#allocation2 + $0x20] sm:$0xff]  ;;  %s276_s10 = sand.u32 1, %s996_s22  }
  0x37   : > { %s1247_s13 = smov (!%p287_p5, %s763_s13), 7  ;;  %853 = vmatprep.subr.msk.bf16.mxu0 %vm339_vm0, %v307_v3  ;;  %v341_v7 = vsel %vm339_vm0, %v307_v3, 0  ;;  %v325_v27 = vpack.c.bf16 %v311_v25, %v310_v24  ;;  %v313_v29 = vld [vmem:[#allocation2 + $0x28] sm:$0xff]  ;;  %v314_v31 = vld [vmem:[#allocation2 + $0x30] sm:$0xff]  ;;  %v315_v32 = vld [vmem:[#allocation2 + $0x38] sm:$0xff]  ;;  %s759_s15 = sshll.u32 %s276_s10, 5 }
  0x38   : > { %s764_s14 = sshll.u32 %s1247_s13, 3  ;;  %804 = vmatpush3.bf16.msra.mxu0 %v341_v7  ;;  %s1249_s9 = smov (!%p280_p6, %s760_s9), 3  ;;  %v326_v30 = vpack.c.bf16 %v313_v29, %v312_v28  ;;  %v327_v33 = vpack.c.bf16 %v315_v32, %v314_v31  ;;  %v316_v34 = vld [vmem:[#allocation2 + $0x40] sm:$0xff]  ;;  %v317_v35 = vld [vmem:[#allocation2 + $0x48] sm:$0xff]  ;;  %v318_v37 = vld [vmem:[#allocation2 + $0x50] sm:$0xff] }
  0x39   : > { %s290_s16 = scalar_lea.vmem %s1224_s1, %s764_s14  ;;  %815 = vmatprep.subr.bf16.mxu0 %v1009_v9  ;;  %s779_s18 = sshll.u32 %s1249_s9, 4  ;;  %v328_v36 = vpack.c.bf16 %v317_v35, %v316_v34  ;;  %v319_v38 = vld [vmem:[#allocation2 + $0x58] sm:$0xff]  ;;  %v320_v40 = vld [vmem:[#allocation2 + $0x60] sm:$0xff]  ;;  %v321_v41 = vld [vmem:[#allocation2 + $0x68] sm:$0xff] }
  0x3a   : > { %v300_v1 = vld [vmem:[%s290_s16] sm:$0xff]  ;;  %v301_v2 = vld [vmem:[%s290_s16 + $0x8] sm:$0xff]  ;;  %v302_v5 = vld [vmem:[%s290_s16 + $0x10] sm:$0xff]  ;;  %s284_s26 = scalar_lea.vmem %s1223_s0, %s779_s18  ;;  %v329_v39 = vpack.c.bf16 %v319_v38, %v318_v37  ;;  %v330_v42 = vpack.c.bf16 %v321_v41, %v320_v40  ;;  %s278_s12 = scalar_lea.vmem [#allocation5], %s759_s15 }
  0x3b   : > { %v304_v4 = vpack.c.bf16 %v301_v2, %v300_v1  ;;  %v303_v6 = vld [vmem:[%s290_s16 + $0x18] sm:$0xff]  ;;  %v296_v14 = vld [vmem:[%s284_s26 + $0x10] sm:$0xff]  ;;  %v294_v17 = vld [vmem:[%s284_s26] sm:$0xff]  ;;  %s667_s16 = sshll.u32 %s278_s12, 4  ;;  %s781_s17 = sshll.u32 %s1070_s25, 9  ;;  %s1175_s16 = int_to_ptr.vmem [resolvable:$true] %s667_s16 }
  0x3c   : > { %v305_v8 = vpack.c.bf16 %v303_v6, %v302_v5  ;;  %v297_v15 = vld [vmem:[%s284_s26 + $0x18] sm:$0xff]  ;;  %v295_v18 = vld [vmem:[%s284_s26 + $0x8] sm:$0xff]  ;;  %v322_v43 = vld [vmem:[#allocation2 + $0x70] sm:$0xff]  ;;  %s1180_s18 = scalar_lea.hbm %s1229_s6, %s781_s17  ;;  %s1182_s19 = scalar_lea.sflag [#allocation4], %s276_s10 }
  0x3d   : > { %805 = vmatprep.mubr.msk.bf16.mxu0 %vm332_vm1, %v304_v4  ;;  %v1149_v23 = vpack.c.bf16 %v297_v15, %v296_v14  ;;  %v1151_v26 = vpack.c.bf16 %v295_v18, %v294_v17  ;;  %v323_v44 = vld [vmem:[#allocation2 + $0x78] sm:$0xff]  ;;  %v769_v46 = vld [vmem:[%s1226_s3] ss:$0 sm:$0xff]  ;;  %s938_s25 = scalar_lea.vmem %s1175_s16, 512  ;;  %p1240_p10 = scmp.ne.s32.totalorder %s1233_s7, 0 }
  0x3e   : > { %806 = vmatmul.mubr.msk.bf16.vlgmr.msra.gmra.mrb[0].mxu0 %vm332_vm1, %v305_v8  ;;  %v331_v45 = vpack.c.bf16 %v323_v44, %v322_v43  ;;  %v772_v7 = vld [vmem:[%s1228_s5] ss:$0 sm:$0xff]  ;;  %p939_p9 = scmp.ne.s32.totalorder %s1175_s16, %s938_s25  ;;  %s1011_s20 = smov [#allocation5]  }
  0x3f   : > { %817 = vmatprep.mubr.msk.bf16.mxu0 %vm1010_vm2, %v1009_v9  ;;  %s942_s26 = sshll.u32 %s1011_s20, 4  ;;  %s943_s26 = int_to_ptr.vmem [resolvable:$false] %s942_s26 }
  0x40   : > { %p940_p12 = pnand %p939_p9, %p1240_p10  ;;  %s944_s28 = scalar_lea.vmem %s943_s26, 1024 }
  0x41   : > { %p945_p3 = scmp.lt.s32.totalorder %s1175_s16, %s943_s26  ;;  %p946_p4 = scmp.lt.s32.totalorder %s944_s28, %s938_s25 }
  0x42   : > { %p941_p2 = pneg %p940_p12 }
  0x43   : > { %p947_p7 = por %p946_p4, %p945_p3 }
  0x45   : > { %p948_p8 = pnand %p947_p7, %p941_p2 }
 0x111   : > { %v807_v10 = vpop.f32.mrb[0].mxu0 }
 0x112   : > { %v377_v13 = vpop.f32.mrb[1].mxu0 }
 0x113   : > { %v808_v16 = vpop.f32.mrb[2].mxu0 }
 0x114   : > { %v393_v19 = vpack.c.bf16 %v808_v16, %v807_v10  ;;  %v380_v20 = vpop.f32.mrb[3].mxu0 }
 0x115   : > { %v392_v22 = vpack.c.bf16 %v380_v20, %v377_v13 }
 0x116   : > { %816 = vmatpush3.bf16.msra.mxu0 %v393_v19 }
 0x117   : > { %810 = vmatpush3.bf16.msra.mxu1 %v392_v22  ;;  %841 = vmatprep.subr.bf16.mxu0 %v1009_v9 }
 0x118   : > { %821 = vmatprep.subr.bf16.mxu1 %v324_v21 }
 0x119   : > { %818 = vmatmul.mubr.msk.bf16.vlgmr.msra.gmra.mrb[4].mxu0 %vm394_vm3, %v1149_v23 }
 0x11a   : > { %812 = vmatmul.mubr.msk.bf16.vlgmr.msra.gmra.mrb[0].mxu1 %vm394_vm3, %v1151_v26  ;;  %843 = vmatprep.mubr.msk.bf16.mxu0 %vm1010_vm2, %v1009_v9 }
 0x11b   : > { %822 = vmatpush3.bf16.msra.mxu1 %v324_v21 }
 0x11c   : > { %823 = vmatprep.subr.bf16.mxu1 %v325_v27 }
 0x11f   : > { %824 = vmatpush3.bf16.msra.mxu1 %v325_v27 }
 0x120   : > { %825 = vmatprep.subr.bf16.mxu1 %v326_v30 }
 0x123   : > { %826 = vmatpush3.bf16.msra.mxu1 %v326_v30 }
 0x124   : > { %827 = vmatprep.subr.bf16.mxu1 %v327_v33 }
 0x127   : > { %828 = vmatpush3.bf16.msra.mxu1 %v327_v33 }
 0x128   : > { %829 = vmatprep.subr.bf16.mxu1 %v328_v36 }
 0x12b   : > { %830 = vmatpush3.bf16.msra.mxu1 %v328_v36 }
 0x12c   : > { %831 = vmatprep.subr.bf16.mxu1 %v329_v39 }
 0x12f   : > { %832 = vmatpush3.bf16.msra.mxu1 %v329_v39 }
 0x130   : > { %833 = vmatprep.subr.bf16.mxu1 %v330_v42 }
 0x133   : > { %834 = vmatpush3.bf16.msra.mxu1 %v330_v42 }
 0x134   : > { %835 = vmatprep.subr.bf16.mxu1 %v331_v45 }
 0x137   : > { %836 = vmatpush3.bf16.msra.mxu1 %v331_v45 }
 0x1ec   : > { %v476_v47 = vpop.f32.mrb[4].mxu0 }
 0x1ed   : > { %v492_v48 = vadd.f32 %v769_v46, %v476_v47  ;;  %v432_v49 = vpop.f32.mrb[0].mxu1  ;;  %v819_v50 = vpop.f32.mrb[5].mxu0 }
 0x1ee   : > { %v490_v51 = vadd.f32 %v769_v46, %v432_v49  ;;  %v813_v52 = vpop.f32.mrb[1].mxu1  ;;  %v479_v53 = vpop.f32.mrb[6].mxu0 }
 0x1ef   : > { %v496_v54 = vmax.f32 %v492_v48, 0.0  ;;  %v493_v55 = vadd.f32 %v769_v46, %v479_v53  ;;  %v435_v56 = vpop.f32.mrb[2].mxu1  ;;  %v820_v57 = vpop.f32.mrb[7].mxu0 }
 0x1f0   : > { %v491_v58 = vadd.f32 %v769_v46, %v435_v56  ;;  %v814_v59 = vpop.f32.mrb[3].mxu1  ;;  %v494_v61 = vmax.f32 %v490_v51, 0.0 }
 0x1f1   : > { %v497_v60 = vmax.f32 %v493_v55, 0.0 }
 0x1f2   : > { %v495_v62 = vmax.f32 %v491_v58, 0.0 }
 0x1f3   : > { %v499_v63 = vpack.c.bf16 %v497_v60, %v496_v54 }
 0x1f4   : > { %v498_v0 = vpack.c.bf16 %v495_v62, %v494_v61 }
 0x1f6   : > { %837 = vmatprep.mubr.bf16.mxu1 %v498_v0 }
 0x1f7   : > { %838 = vmatmul.mubr.bf16.vlgmr.msra.gmra.mrb[4].mxu1 %v499_v63 }
 0x2ca   : > { %v839_v1 = vpop.f32.mrb[4].mxu1 }
 0x2cb   : > { %v534_v2 = vpop.f32.mrb[5].mxu1 }
 0x2cc   : > { %v840_v3 = vpop.f32.mrb[6].mxu1 }
 0x2cd   : > { %v550_v4 = vpack.c.bf16 %v840_v3, %v839_v1  ;;  %v537_v5 = vpop.f32.mrb[7].mxu1 }
 0x2ce   : > { %v549_v6 = vpack.c.bf16 %v537_v5, %v534_v2 }
 0x2d0   : > { %842 = vmatpush3.bf16.msra.mxu0 %v549_v6 }
 0x2d1   : > { %847 = vmatprep.subr.bf16.mxu0 %v1009_v9 }
 0x2d3   : > { %844 = vmatmul.mubr.msk.bf16.vlgmr.msra.gmra.mrb[8].mxu0 %vm394_vm3, %v1151_v26 }
 0x2d4   : > { %848 = vmatpush3.bf16.msra.mxu0 %v550_v4  ;;  %849 = vmatprep.mubr.msk.bf16.mxu0 %vm1010_vm2, %v1009_v9 }
 0x2db   : > { %850 = vmatmul.mubr.msk.bf16.vlgmr.msra.gmra.mrb[12].mxu0 %vm394_vm3, %v1149_v23 }
 0x3a6   : > { %v585_v8 = vpop.f32.mrb[8].mxu0 }
 0x3a7   : > { %v640_v10 = vadd.f32 %v772_v7, %v585_v8  ;;  %v845_v11 = vpop.f32.mrb[9].mxu0 }
 0x3a8   : > { %v588_v12 = vpop.f32.mrb[10].mxu0 }
 0x3a9   : > { %v644_v13 = vmax.f32 %v640_v10, 0.0  ;;  %v641_v14 = vadd.f32 %v772_v7, %v588_v12  ;;  %v846_v15 = vpop.f32.mrb[11].mxu0 }
 0x3ab   : > { %648 = vst [vmem:[%s278_s12] sm:$0xff] %v644_v13  ;;  %v645_v9 = vmax.f32 %v641_v14, 0.0 }
 0x3ad   : > { %649 = vst [vmem:[%s278_s12 + $0x8] sm:$0xff] %v645_v9 }
 0x3ae   : > { %v626_v16 = vpop.f32.mrb[12].mxu0 }
 0x3af   : > { %v642_v17 = vadd.f32 %v772_v7, %v626_v16  ;;  %v851_v18 = vpop.f32.mrb[13].mxu0 }
 0x3b0   : > { %v629_v19 = vpop.f32.mrb[14].mxu0 }
 0x3b1   : > { %v646_v20 = vmax.f32 %v642_v17, 0.0  ;;  %v643_v21 = vadd.f32 %v772_v7, %v629_v19  ;;  %v852_v22 = vpop.f32.mrb[15].mxu0 }
 0x3b3   : > { %650 = vst [vmem:[%s278_s12 + $0x10] sm:$0xff] %v646_v20  ;;  %v647_v23 = vmax.f32 %v643_v21, 0.0 }
 0x3b5   : > { %651 = vst [vmem:[%s278_s12 + $0x18] sm:$0xff] %v647_v23 }
 0x3b6   : > { %951 = shalt.err (!%p948_p8)
}
 0x3b7   : > { %s952_s29 = scalar_lea.hbm %s1180_s18, 512  ;;  %s956_s14 = scalar_lea.hbm %s1229_s6, 1024 }
 0x3b8   : > { %p953_p11 = scmp.ne.s32.totalorder %s1180_s18, %s952_s29  ;;  %p957_p0 = scmp.lt.u32.totalorder %s1180_s18, %s1229_s6 }
 0x3b9   : > { %p958_p5 = scmp.lt.u32.totalorder %s956_s14, %s952_s29  ;;  %p960_p9 = scmp.lt.u32.totalorder %s952_s29, %s1180_s18 }
 0x3ba   : > { %p954_p13 = pnand %p953_p11, %p1240_p10 }
 0x3bb   : > { %p959_p6 = por %p958_p5, %p957_p0 }
 0x3bc   : > { %p955_p1 = pneg %p954_p13 }
 0x3bd   : > { %p961_p12 = por %p960_p9, %p959_p6 }
 0x3bf   : > { %p962_p2 = pnand %p961_p12, %p955_p1 }
 0x3c1   : > { %965 = shalt.err (!%p962_p2)
}
 0x3c2   : > { %s1012_s17 = smov 128   ;;  %s1013_s11 = smov 8  }
 0x3c3   : > { %858 = dma.vmem_to_hbm [thread:$0]  (%p1240_p10), %s1175_s16, 512, %s1180_s18, %s1182_s19, %s1012_s17, %s1012_s17, %s1013_s11  }
 0x3c4 PF: > { %p870_p3 = scmp.ge.s32.totalorder %s1004_s24, 2  ;;  %s682_s9 = sand.u32 1, %s992_s21  }
 0x3c5   : > { %p1241_p4 = scmp.ne.s32.totalorder %s1234_s8, 0  ;;  %s683_s25 = scalar_lea.sflag [#allocation4], %s682_s9 }
 0x3c7   : > { %p865_p7 = pnand %p870_p3, %p1241_p4 }
 0x3c9   : > { %987 = dma.done.wait (!%p865_p7), %s683_s25, 512  }
 0x3ca   : > { %989 = vsyncadd (!%p865_p7), %s683_s25, 4294966784  ;;  %p17_p8 = scmp.ge.s32.totalorder %s1074_s27, 4   ;;  %s1242_s21 = smov %s996_s22 }
 0x3cb   : > { %s1243_s22 = smov %s1000_s23  ;;  %s1244_s23 = smov %s1085_s30 }
 0x3cc   : > { %s1245_s24 = smov %s1074_s27  ;;  %19 = sbr.rel (!%p17_p8) target bundleno = 4 (0x4), region = 87 }
 0x3d3   :  { %688 = vsyncpa [#allocation3], 1 }
 0x3d4   :  { %690 = vsyncpa [#allocation3 + $0x1], 1 }
 0x3d5   :  { %691 = vsyncpa [#allocation4], 1 }
 0x3d6   :  { %693 = vsyncpa [#allocation4 + $0x1], 1 }

</bundles_post_ra>
